<compile_context>
chip_gen: v7x
topology: tpu7x:2x2x1
jax: 0.10.0
libtpu: 0.0.40
codegen_flags: <defaults>
</compile_context>

<pallas_src>
import functools

import jax
import jax.numpy as jnp
from jax.experimental import pallas as pl
from jax.experimental.pallas import tpu as pltpu


_PAD = 128  # lane-aligned left pad of the A line buffer


def _make_abf_kernel(strip_h, w, cin, cm, co):
    """Fused ABF kernel for one (image, row-strip) block."""
    n_out = strip_h * w              # output pixels per strip
    lh = (strip_h + 2) * w           # strip pixels including 1-row halo

    def kernel(x_ref, y_ref, mask_ref, wxc_ref, way_ref, bc_ref,
               w2_ref, s2_ref, b2_ref, o_ref, abuf_ref):
        s = pl.program_id(1)
        ns = pl.num_programs(1)

        xv = x_ref[0, 0]             # (cin, lh) bf16
        yv = y_ref[0, 0]             # (cm,  lh) bf16

        # ---- Stage 1: conv1(1x1)+BN1 fused with the x-half of att_conv in a
        # single (cm+2)-row matmul; y-half of the logits is a true 2-row
        # matmul (no zero-block weight).
        t = (jnp.dot(wxc_ref[...], xv, preferred_element_type=jnp.float32)
             + bc_ref[...])                                   # (cm+2, lh) f32
        zy = jnp.dot(way_ref[...], yv,
                     preferred_element_type=jnp.float32)      # (2, lh) f32
        x1 = t[:cm, :]                                        # (cm, lh)
        z = jax.nn.sigmoid(t[cm:cm + 2, :] + zy)              # (2, lh)
        a = x1 * z[0:1, :] + yv.astype(jnp.float32) * z[1:2, :]

        # Zero the halo rows that fall outside the image (conv2 zero padding),
        # folded into the bf16 cast of A.
        top_drop = jnp.where(s > 0, 0.0, 1.0)
        bot_drop = jnp.where(s < ns - 1, 0.0, 1.0)
        keep = 1.0 - mask_ref[2:3, :] * top_drop - mask_ref[3:4, :] * bot_drop
        a_bf = (a * keep).astype(jnp.bfloat16)                # (cm, lh) bf16

        # ---- Stage 2: 3x3 conv (padding=1) + BN2 via 9 accumulating matmuls
        # over lane-shifted taps of the flat-padded bf16 line buffer.
        abuf_ref[:, _PAD:_PAD + lh] = a_bf                    # aligned store

        mleft = mask_ref[0:1, :n_out] > 0.5                   # col >= 1
        mright = mask_ref[1:2, :n_out] > 0.5                  # col <= w-2

        acc = jnp.zeros((co, n_out), jnp.float32)
        for dy in range(3):
            for dx in range(3):
                k = dy * 3 + dx
                start = _PAD + dy * w + dx - 1
                tap = abuf_ref[:, start:start + n_out]        # (cm, n_out)
                if dx == 0:
                    tap = jnp.where(mleft, tap, jnp.zeros_like(tap))
                elif dx == 2:
                    tap = jnp.where(mright, tap, jnp.zeros_like(tap))
                acc = acc + jnp.dot(w2_ref[k], tap,
                                    preferred_element_type=jnp.float32)

        bout = acc * s2_ref[...] + b2_ref[...]                # BN2 in f32
        o_ref[0, 0] = bout.astype(o_ref.dtype)

    return kernel


def _fold_bn(gamma, beta, mean, var, eps=1e-5):
    s = gamma / jnp.sqrt(var + eps)
    b = beta - mean * s
    return s, b


def _pick_strip_h(h, w, cm, budget_bytes=4 << 20):
    """Largest divisor of h whose bf16 A line buffer fits a modest budget and
    (when possible) gives a lane-dense (multiple of 128) output strip."""
    best = h
    for sh in range(1, h + 1):
        if h % sh:
            continue
        buf = cm * (2 * _PAD + (sh + 2) * w) * 2
        if buf <= budget_bytes and ((sh * w) % 128 == 0 or sh == h):
            best = sh
    return best


def init_abf_params(key, in_channel, mid_channel, out_channel):
    """Random parameters in PyTorch-equivalent layouts."""
    ks = jax.random.split(key, 12)
    w1 = jax.random.uniform(ks[0], (mid_channel, in_channel), jnp.float32, -0.5, 0.5)
    w2 = jax.random.uniform(ks[1], (out_channel, mid_channel, 3, 3), jnp.float32, -0.2, 0.2)
    wa = jax.random.uniform(ks[2], (2, 2 * mid_channel), jnp.float32, -0.3, 0.3)
    ba = jax.random.uniform(ks[3], (2,), jnp.float32, -0.1, 0.1)
    g1 = 1.0 + 0.1 * jax.random.normal(ks[4], (mid_channel,))
    be1 = 0.05 * jax.random.normal(ks[5], (mid_channel,))
    m1 = 0.1 * jax.random.normal(ks[6], (mid_channel,))
    v1 = 1.0 + 0.1 * jax.random.uniform(ks[7], (mid_channel,))
    g2 = 1.0 + 0.1 * jax.random.normal(ks[8], (out_channel,))
    be2 = 0.05 * jax.random.normal(ks[9], (out_channel,))
    m2 = 0.1 * jax.random.normal(ks[10], (out_channel,))
    v2 = 1.0 + 0.1 * jax.random.uniform(ks[11], (out_channel,))
    return {"w1": w1, "w2": w2, "wa": wa, "ba": ba,
            "bn1": (g1, be1, m1, v1), "bn2": (g2, be2, m2, v2)}


@functools.partial(jax.jit, static_argnames=("shape", "strip_h"))
def abf_forward(params, x_nchw, y_nchw, shape, strip_h=None):
    n, cin, h, w = x_nchw.shape
    cm = params["w1"].shape[0]
    co = params["w2"].shape[0]
    # PyTorch cat([conv1(x), interp(y, [shape, shape])]) requires shape == H == W.
    assert shape == h and shape == w, "ABF needs y upsampled to x's spatial size"

    if strip_h is None:
        strip_h = _pick_strip_h(h, w, cm)
    assert h % strip_h == 0
    s_cnt = h // strip_h
    n_out = strip_h * w
    lh = (strip_h + 2) * w

    # Nearest-neighbor upsample (matches F.interpolate: src = floor(dst*in/out)).
    _, _, hy, wy = y_nchw.shape
    rows = (jnp.arange(shape) * hy) // shape
    cols = (jnp.arange(shape) * wy) // shape
    y_up = y_nchw[:, :, rows, :][:, :, :, cols]                # (n, cm, h, w)

    def to_strips(t):
        # (n, c, h, w) -> (n, S, c, (strip_h+2)*w)  row strips with 1-row halo
        c = t.shape[1]
        tp = jnp.pad(t, ((0, 0), (0, 0), (1, 1), (0, 0)))
        ridx = (jnp.arange(s_cnt)[:, None] * strip_h
                + jnp.arange(strip_h + 2)[None, :])            # (S, strip_h+2)
        ts = tp[:, :, ridx, :]                                 # (n,c,S,sh+2,w)
        return ts.transpose(0, 2, 1, 3, 4).reshape(n, s_cnt, c, lh)

    x_s = to_strips(x_nchw).astype(jnp.bfloat16)
    y_s = to_strips(y_up).astype(jnp.bfloat16)

    # Fold BN1 into conv1, then fold conv1 into the x-half of att_conv so
    # stage 1 is one (cm+2)-row weight on x plus a 2-row weight on y.
    s1, b1 = _fold_bn(*params["bn1"])
    s2, b2 = _fold_bn(*params["bn2"])
    m1 = params["w1"] * s1[:, None]                            # (cm, cin)
    wa_x = params["wa"][:, :cm]                                # (2, cm)
    wa_y = params["wa"][:, cm:]                                # (2, cm)
    wxc = jnp.concatenate([m1, wa_x @ m1], axis=0)             # (cm+2, cin)
    bcomb = jnp.concatenate([b1, wa_x @ b1 + params["ba"]])[:, None]
    # conv2 weight per tap: w2f[dy*3+dx] = w2[:, :, dy, dx]  -> (9, co, cm)
    w2f = params["w2"].transpose(2, 3, 0, 1).reshape(9, co, cm)

    # Masks (4, lh):
    #   row 0: left-neighbor valid  (col >= 1),   over output positions [:n_out]
    #   row 1: right-neighbor valid (col <= w-2), over output positions [:n_out]
    #   row 2: indicator of the top    halo row within the (strip_h+2)-row block
    #   row 3: indicator of the bottom halo row within the block
    col = jnp.tile(jnp.arange(w), strip_h)
    mleft = jnp.pad((col >= 1).astype(jnp.float32), (0, lh - n_out))
    mright = jnp.pad((col <= w - 2).astype(jnp.float32), (0, lh - n_out))
    pos = jnp.arange(lh)
    is_top = (pos < w).astype(jnp.float32)
    is_bot = (pos >= lh - w).astype(jnp.float32)
    masks = jnp.stack([mleft, mright, is_top, is_bot], axis=0)  # (4, lh)

    kernel = _make_abf_kernel(strip_h, w, cin, cm, co)
    out = pl.pallas_call(
        kernel,
        out_shape=jax.ShapeDtypeStruct((n, s_cnt, co, n_out), jnp.float32),
        grid_spec=pltpu.PrefetchScalarGridSpec(
            num_scalar_prefetch=0,
            grid=(n, s_cnt),
            in_specs=[
                pl.BlockSpec((1, 1, cin, lh), lambda b, s: (b, s, 0, 0)),
                pl.BlockSpec((1, 1, cm, lh), lambda b, s: (b, s, 0, 0)),
                pl.BlockSpec((4, lh), lambda b, s: (0, 0)),
                pl.BlockSpec((cm + 2, cin), lambda b, s: (0, 0)),
                pl.BlockSpec((2, cm), lambda b, s: (0, 0)),
                pl.BlockSpec((cm + 2, 1), lambda b, s: (0, 0)),
                pl.BlockSpec((9, co, cm), lambda b, s: (0, 0, 0)),
                pl.BlockSpec((co, 1), lambda b, s: (0, 0)),
                pl.BlockSpec((co, 1), lambda b, s: (0, 0)),
            ],
            out_specs=pl.BlockSpec((1, 1, co, n_out), lambda b, s: (b, s, 0, 0)),
            scratch_shapes=[
                pltpu.VMEM((cm, 2 * _PAD + lh), jnp.bfloat16),  # A line buffer
            ],
        ),
        compiler_params=pltpu.CompilerParams(
            dimension_semantics=("parallel", "parallel")),
    )(x_s, y_s, masks,
      wxc.astype(jnp.bfloat16), wa_y.astype(jnp.bfloat16),
      bcomb.astype(jnp.float32),
      w2f.astype(jnp.bfloat16), s2[:, None], b2[:, None])

    # (n, S, co, strip_h*w) -> NCHW
    return (out.reshape(n, s_cnt, co, strip_h, w)
            .transpose(0, 2, 1, 3, 4)
            .reshape(n, co, h, w))


if __name__ == "__main__":
    key = jax.random.PRNGKey(0)
    k_params, kx, ky = jax.random.split(key, 3)

    in_channel, mid_channel, out_channel = 4, 8, 8
    n, h, w = 2, 16, 16

    params = init_abf_params(k_params, in_channel, mid_channel, out_channel)
    x = jax.random.normal(kx, (n, in_channel, h, w), jnp.float32)          # NCHW
    y = jax.random.normal(ky, (n, mid_channel, h // 2, w // 2), jnp.float32)

    out = abf_forward(params, x, y, h, strip_h=8)   # 2 row strips per image
    jax.block_until_ready(out)
    assert out.shape == (n, out_channel, h, w), out.shape
    print("KERNEL_OK")
</pallas_src>

<mosaic_0001>
module attributes {stable_mosaic.version = 11 : i64} {
  func.func @kernel(%arg0: i32, %arg1: i32, %arg2: memref<1x1x4x160xbf16, #tpu.memory_space<vmem>>, %arg3: memref<1x1x8x160xbf16, #tpu.memory_space<vmem>>, %arg4: memref<4x160xf32, #tpu.memory_space<vmem>>, %arg5: memref<10x4xbf16, #tpu.memory_space<vmem>>, %arg6: memref<2x8xbf16, #tpu.memory_space<vmem>>, %arg7: memref<10x1xf32, #tpu.memory_space<vmem>>, %arg8: memref<9x8x8xbf16, #tpu.memory_space<vmem>>, %arg9: memref<8x1xf32, #tpu.memory_space<vmem>>, %arg10: memref<8x1xf32, #tpu.memory_space<vmem>>, %arg11: memref<1x1x8x128xf32, #tpu.memory_space<vmem>>, %arg12: memref<8x416xbf16, #tpu.memory_space<vmem>>) attributes {dimension_semantics = [#tpu.dimension_semantics<parallel>, #tpu.dimension_semantics<parallel>], iteration_bounds = array<i64: 2, 2>, scalar_prefetch = 0 : i64, scratch_operands = 1 : i64, tpu.core_type = #tpu.core_type<tc>, window_params = [{transform_indices = @transform_0, window_bounds = array<i64: 1, 1, 4, 160>}, {transform_indices = @transform_1, window_bounds = array<i64: 1, 1, 8, 160>}, {pipeline_mode = #tpu.pipeline_mode<synchronous>, transform_indices = @transform_2, window_bounds = array<i64: 4, 160>}, {pipeline_mode = #tpu.pipeline_mode<synchronous>, transform_indices = @transform_3, window_bounds = array<i64: 10, 4>}, {pipeline_mode = #tpu.pipeline_mode<synchronous>, transform_indices = @transform_4, window_bounds = array<i64: 2, 8>}, {pipeline_mode = #tpu.pipeline_mode<synchronous>, transform_indices = @transform_5, window_bounds = array<i64: 10, 1>}, {pipeline_mode = #tpu.pipeline_mode<synchronous>, transform_indices = @transform_6, window_bounds = array<i64: 9, 8, 8>}, {pipeline_mode = #tpu.pipeline_mode<synchronous>, transform_indices = @transform_7, window_bounds = array<i64: 8, 1>}, {pipeline_mode = #tpu.pipeline_mode<synchronous>, transform_indices = @transform_8, window_bounds = array<i64: 8, 1>}, {transform_indices = @transform_9, window_bounds = array<i64: 1, 1, 8, 128>}]} {
    %c0 = arith.constant 0 : index
    %c0_0 = arith.constant 0 : index
    %c0_1 = arith.constant 0 : index
    %c0_2 = arith.constant 0 : index
    %0 = vector.load %arg2[%c0, %c0_0, %c0_1, %c0_2] : memref<1x1x4x160xbf16, #tpu.memory_space<vmem>>, vector<1x1x4x160xbf16>
    %1 = vector.shape_cast %0 : vector<1x1x4x160xbf16> to vector<4x160xbf16>
    %c0_3 = arith.constant 0 : index
    %c0_4 = arith.constant 0 : index
    %c0_5 = arith.constant 0 : index
    %c0_6 = arith.constant 0 : index
    %2 = vector.load %arg3[%c0_3, %c0_4, %c0_5, %c0_6] : memref<1x1x8x160xbf16, #tpu.memory_space<vmem>>, vector<1x1x8x160xbf16>
    %3 = vector.shape_cast %2 : vector<1x1x8x160xbf16> to vector<8x160xbf16>
    %c0_7 = arith.constant 0 : index
    %c0_8 = arith.constant 0 : index
    %4 = vector.load %arg5[%c0_7, %c0_8] : memref<10x4xbf16, #tpu.memory_space<vmem>>, vector<10x4xbf16>
    %cst = arith.constant dense<0.000000e+00> : vector<10x160xf32>
    %5 = tpu.matmul %4, %1, %cst {dimension_numbers = #tpu.dot_dimension_numbers<[1], [0], [0], [1], [0, 0, 1, 1], [], []>} : vector<10x4xbf16>, vector<4x160xbf16>, vector<10x160xf32> -> vector<10x160xf32>
    %c0_9 = arith.constant 0 : index
    %c0_10 = arith.constant 0 : index
    %6 = vector.load %arg7[%c0_9, %c0_10] : memref<10x1xf32, #tpu.memory_space<vmem>>, vector<10x1xf32>
    %7 = vector.broadcast %6 : vector<10x1xf32> to vector<10x160xf32>
    %8 = arith.addf %5, %7 : vector<10x160xf32>
    %c0_11 = arith.constant 0 : index
    %c0_12 = arith.constant 0 : index
    %9 = vector.load %arg6[%c0_11, %c0_12] : memref<2x8xbf16, #tpu.memory_space<vmem>>, vector<2x8xbf16>
    %cst_13 = arith.constant dense<0.000000e+00> : vector<2x160xf32>
    %10 = tpu.matmul %9, %3, %cst_13 {dimension_numbers = #tpu.dot_dimension_numbers<[1], [0], [0], [1], [0, 0, 1, 1], [], []>} : vector<2x8xbf16>, vector<8x160xbf16>, vector<2x160xf32> -> vector<2x160xf32>
    %11 = vector.extract_strided_slice %8 {offsets = [0, 0], sizes = [8, 160], strides = [1, 1]} : vector<10x160xf32> to vector<8x160xf32>
    %12 = vector.extract_strided_slice %8 {offsets = [8, 0], sizes = [2, 160], strides = [1, 1]} : vector<10x160xf32> to vector<2x160xf32>
    %13 = arith.addf %12, %10 : vector<2x160xf32>
    %14 = arith.negf %13 : vector<2x160xf32>
    %15 = math.exp %14 : vector<2x160xf32>
    %cst_14 = arith.constant 1.000000e+00 : f32
    %16 = vector.broadcast %cst_14 : f32 to vector<2x160xf32>
    %17 = arith.addf %16, %15 : vector<2x160xf32>
    %18 = arith.divf %16, %17 : vector<2x160xf32>
    %19 = vector.extract_strided_slice %18 {offsets = [0, 0], sizes = [1, 160], strides = [1, 1]} : vector<2x160xf32> to vector<1x160xf32>
    %20 = vector.broadcast %19 : vector<1x160xf32> to vector<8x160xf32>
    %21 = arith.mulf %11, %20 : vector<8x160xf32>
    %22 = arith.extf %3 : vector<8x160xbf16> to vector<8x160xf32>
    %23 = vector.extract_strided_slice %18 {offsets = [1, 0], sizes = [1, 160], strides = [1, 1]} : vector<2x160xf32> to vector<1x160xf32>
    %24 = vector.broadcast %23 : vector<1x160xf32> to vector<8x160xf32>
    %25 = arith.mulf %22, %24 : vector<8x160xf32>
    %26 = arith.addf %21, %25 : vector<8x160xf32>
    %c0_i32 = arith.constant 0 : i32
    %27 = arith.cmpi sgt, %arg1, %c0_i32 : i32
    %cst_15 = arith.constant 0.000000e+00 : f32
    %cst_16 = arith.constant 1.000000e+00 : f32
    %28 = arith.select %27, %cst_15, %cst_16 : f32
    %c1_i32 = arith.constant 1 : i32
    %29 = arith.cmpi slt, %arg1, %c1_i32 : i32
    %cst_17 = arith.constant 0.000000e+00 : f32
    %cst_18 = arith.constant 1.000000e+00 : f32
    %30 = arith.select %29, %cst_17, %cst_18 : f32
    %c2 = arith.constant 2 : index
    %c0_19 = arith.constant 0 : index
    %31 = vector.load %arg4[%c2, %c0_19] : memref<4x160xf32, #tpu.memory_space<vmem>>, vector<1x160xf32>
    %32 = vector.broadcast %28 : f32 to vector<1x160xf32>
    %33 = arith.mulf %31, %32 : vector<1x160xf32>
    %cst_20 = arith.constant 1.000000e+00 : f32
    %34 = vector.broadcast %cst_20 : f32 to vector<1x160xf32>
    %35 = arith.subf %34, %33 : vector<1x160xf32>
    %c3 = arith.constant 3 : index
    %c0_21 = arith.constant 0 : index
    %36 = vector.load %arg4[%c3, %c0_21] : memref<4x160xf32, #tpu.memory_space<vmem>>, vector<1x160xf32>
    %37 = vector.broadcast %30 : f32 to vector<1x160xf32>
    %38 = arith.mulf %36, %37 : vector<1x160xf32>
    %39 = arith.subf %35, %38 : vector<1x160xf32>
    %40 = vector.broadcast %39 : vector<1x160xf32> to vector<8x160xf32>
    %41 = arith.mulf %26, %40 : vector<8x160xf32>
    %42 = arith.truncf %41 : vector<8x160xf32> to vector<8x160xbf16>
    %c0_22 = arith.constant 0 : index
    %c128 = arith.constant 128 : index
    %43 = vector.load %arg12[%c0_22, %c128] : memref<8x416xbf16, #tpu.memory_space<vmem>>, vector<8x160xbf16>
    tpu.vector_store %arg12[%c0_22, %c128], %42 {strides = array<i32>} : memref<8x416xbf16, #tpu.memory_space<vmem>>, vector<8x160xbf16>,
    %c0_23 = arith.constant 0 : index
    %c0_24 = arith.constant 0 : index
    %44 = vector.load %arg4[%c0_23, %c0_24] : memref<4x160xf32, #tpu.memory_space<vmem>>, vector<1x128xf32>
    %cst_25 = arith.constant 5.000000e-01 : f32
    %45 = vector.broadcast %cst_25 : f32 to vector<1x128xf32>
    %46 = arith.cmpf ogt, %44, %45 : vector<1x128xf32>
    %c1 = arith.constant 1 : index
    %c0_26 = arith.constant 0 : index
    %47 = vector.load %arg4[%c1, %c0_26] : memref<4x160xf32, #tpu.memory_space<vmem>>, vector<1x128xf32>
    %cst_27 = arith.constant 5.000000e-01 : f32
    %48 = vector.broadcast %cst_27 : f32 to vector<1x128xf32>
    %49 = arith.cmpf ogt, %47, %48 : vector<1x128xf32>
    %cst_28 = arith.constant 0.000000e+00 : f32
    %50 = vector.broadcast %cst_28 : f32 to vector<8x128xf32>
    %c0_29 = arith.constant 0 : index
    %c127 = arith.constant 127 : index
    %51 = vector.load %arg12[%c0_29, %c127] : memref<8x416xbf16, #tpu.memory_space<vmem>>, vector<8x128xbf16>
    %cst_30 = arith.constant 0.000000e+00 : bf16
    %52 = vector.broadcast %cst_30 : bf16 to vector<8x128xbf16>
    %53 = vector.shape_cast %46 : vector<1x128xi1> to vector<1x128xi1>
    %54 = vector.broadcast %53 : vector<1x128xi1> to vector<8x128xi1>
    %55 = arith.select %54, %51, %52 : vector<8x128xi1>, vector<8x128xbf16>
    %c0_31 = arith.constant 0 : index
    %c0_32 = arith.constant 0 : index
    %c0_33 = arith.constant 0 : index
    %56 = vector.load %arg8[%c0_31, %c0_32, %c0_33] : memref<9x8x8xbf16, #tpu.memory_space<vmem>>, vector<1x8x8xbf16>
    %57 = vector.shape_cast %56 : vector<1x8x8xbf16> to vector<8x8xbf16>
    %cst_34 = arith.constant dense<0.000000e+00> : vector<8x128xf32>
    %58 = tpu.matmul %57, %55, %cst_34 {dimension_numbers = #tpu.dot_dimension_numbers<[1], [0], [0], [1], [0, 0, 1, 1], [], []>} : vector<8x8xbf16>, vector<8x128xbf16>, vector<8x128xf32> -> vector<8x128xf32>
    %59 = arith.addf %50, %58 : vector<8x128xf32>
    %c0_35 = arith.constant 0 : index
    %c128_36 = arith.constant 128 : index
    %60 = vector.load %arg12[%c0_35, %c128_36] : memref<8x416xbf16, #tpu.memory_space<vmem>>, vector<8x128xbf16>
    %c1_37 = arith.constant 1 : index
    %c0_38 = arith.constant 0 : index
    %c0_39 = arith.constant 0 : index
    %61 = vector.load %arg8[%c1_37, %c0_38, %c0_39] : memref<9x8x8xbf16, #tpu.memory_space<vmem>>, vector<1x8x8xbf16>
    %62 = vector.shape_cast %61 : vector<1x8x8xbf16> to vector<8x8xbf16>
    %cst_40 = arith.constant dense<0.000000e+00> : vector<8x128xf32>
    %63 = tpu.matmul %62, %60, %cst_40 {dimension_numbers = #tpu.dot_dimension_numbers<[1], [0], [0], [1], [0, 0, 1, 1], [], []>} : vector<8x8xbf16>, vector<8x128xbf16>, vector<8x128xf32> -> vector<8x128xf32>
    %64 = arith.addf %59, %63 : vector<8x128xf32>
    %c0_41 = arith.constant 0 : index
    %c129 = arith.constant 129 : index
    %65 = vector.load %arg12[%c0_41, %c129] : memref<8x416xbf16, #tpu.memory_space<vmem>>, vector<8x128xbf16>
    %cst_42 = arith.constant 0.000000e+00 : bf16
    %66 = vector.broadcast %cst_42 : bf16 to vector<8x128xbf16>
    %67 = vector.shape_cast %49 : vector<1x128xi1> to vector<1x128xi1>
    %68 = vector.broadcast %67 : vector<1x128xi1> to vector<8x128xi1>
    %69 = arith.select %68, %65, %66 : vector<8x128xi1>, vector<8x128xbf16>
    %c2_43 = arith.constant 2 : index
    %c0_44 = arith.constant 0 : index
    %c0_45 = arith.constant 0 : index
    %70 = vector.load %arg8[%c2_43, %c0_44, %c0_45] : memref<9x8x8xbf16, #tpu.memory_space<vmem>>, vector<1x8x8xbf16>
    %71 = vector.shape_cast %70 : vector<1x8x8xbf16> to vector<8x8xbf16>
    %cst_46 = arith.constant dense<0.000000e+00> : vector<8x128xf32>
    %72 = tpu.matmul %71, %69, %cst_46 {dimension_numbers = #tpu.dot_dimension_numbers<[1], [0], [0], [1], [0, 0, 1, 1], [], []>} : vector<8x8xbf16>, vector<8x128xbf16>, vector<8x128xf32> -> vector<8x128xf32>
    %73 = arith.addf %64, %72 : vector<8x128xf32>
    %c0_47 = arith.constant 0 : index
    %c143 = arith.constant 143 : index
    %74 = vector.load %arg12[%c0_47, %c143] : memref<8x416xbf16, #tpu.memory_space<vmem>>, vector<8x128xbf16>
    %cst_48 = arith.constant 0.000000e+00 : bf16
    %75 = vector.broadcast %cst_48 : bf16 to vector<8x128xbf16>
    %76 = vector.shape_cast %46 : vector<1x128xi1> to vector<1x128xi1>
    %77 = vector.broadcast %76 : vector<1x128xi1> to vector<8x128xi1>
    %78 = arith.select %77, %74, %75 : vector<8x128xi1>, vector<8x128xbf16>
    %c3_49 = arith.constant 3 : index
    %c0_50 = arith.constant 0 : index
    %c0_51 = arith.constant 0 : index
    %79 = vector.load %arg8[%c3_49, %c0_50, %c0_51] : memref<9x8x8xbf16, #tpu.memory_space<vmem>>, vector<1x8x8xbf16>
    %80 = vector.shape_cast %79 : vector<1x8x8xbf16> to vector<8x8xbf16>
    %cst_52 = arith.constant dense<0.000000e+00> : vector<8x128xf32>
    %81 = tpu.matmul %80, %78, %cst_52 {dimension_numbers = #tpu.dot_dimension_numbers<[1], [0], [0], [1], [0, 0, 1, 1], [], []>} : vector<8x8xbf16>, vector<8x128xbf16>, vector<8x128xf32> -> vector<8x128xf32>
    %82 = arith.addf %73, %81 : vector<8x128xf32>
    %c0_53 = arith.constant 0 : index
    %c144 = arith.constant 144 : index
    %83 = vector.load %arg12[%c0_53, %c144] : memref<8x416xbf16, #tpu.memory_space<vmem>>, vector<8x128xbf16>
    %c4 = arith.constant 4 : index
    %c0_54 = arith.constant 0 : index
    %c0_55 = arith.constant 0 : index
    %84 = vector.load %arg8[%c4, %c0_54, %c0_55] : memref<9x8x8xbf16, #tpu.memory_space<vmem>>, vector<1x8x8xbf16>
    %85 = vector.shape_cast %84 : vector<1x8x8xbf16> to vector<8x8xbf16>
    %cst_56 = arith.constant dense<0.000000e+00> : vector<8x128xf32>
    %86 = tpu.matmul %85, %83, %cst_56 {dimension_numbers = #tpu.dot_dimension_numbers<[1], [0], [0], [1], [0, 0, 1, 1], [], []>} : vector<8x8xbf16>, vector<8x128xbf16>, vector<8x128xf32> -> vector<8x128xf32>
    %87 = arith.addf %82, %86 : vector<8x128xf32>
    %c0_57 = arith.constant 0 : index
    %c145 = arith.constant 145 : index
    %88 = vector.load %arg12[%c0_57, %c145] : memref<8x416xbf16, #tpu.memory_space<vmem>>, vector<8x128xbf16>
    %cst_58 = arith.constant 0.000000e+00 : bf16
    %89 = vector.broadcast %cst_58 : bf16 to vector<8x128xbf16>
    %90 = vector.shape_cast %49 : vector<1x128xi1> to vector<1x128xi1>
    %91 = vector.broadcast %90 : vector<1x128xi1> to vector<8x128xi1>
    %92 = arith.select %91, %88, %89 : vector<8x128xi1>, vector<8x128xbf16>
    %c5 = arith.constant 5 : index
    %c0_59 = arith.constant 0 : index
    %c0_60 = arith.constant 0 : index
    %93 = vector.load %arg8[%c5, %c0_59, %c0_60] : memref<9x8x8xbf16, #tpu.memory_space<vmem>>, vector<1x8x8xbf16>
    %94 = vector.shape_cast %93 : vector<1x8x8xbf16> to vector<8x8xbf16>
    %cst_61 = arith.constant dense<0.000000e+00> : vector<8x128xf32>
    %95 = tpu.matmul %94, %92, %cst_61 {dimension_numbers = #tpu.dot_dimension_numbers<[1], [0], [0], [1], [0, 0, 1, 1], [], []>} : vector<8x8xbf16>, vector<8x128xbf16>, vector<8x128xf32> -> vector<8x128xf32>
    %96 = arith.addf %87, %95 : vector<8x128xf32>
    %c0_62 = arith.constant 0 : index
    %c159 = arith.constant 159 : index
    %97 = vector.load %arg12[%c0_62, %c159] : memref<8x416xbf16, #tpu.memory_space<vmem>>, vector<8x128xbf16>
    %cst_63 = arith.constant 0.000000e+00 : bf16
    %98 = vector.broadcast %cst_63 : bf16 to vector<8x128xbf16>
    %99 = vector.shape_cast %46 : vector<1x128xi1> to vector<1x128xi1>
    %100 = vector.broadcast %99 : vector<1x128xi1> to vector<8x128xi1>
    %101 = arith.select %100, %97, %98 : vector<8x128xi1>, vector<8x128xbf16>
    %c6 = arith.constant 6 : index
    %c0_64 = arith.constant 0 : index
    %c0_65 = arith.constant 0 : index
    %102 = vector.load %arg8[%c6, %c0_64, %c0_65] : memref<9x8x8xbf16, #tpu.memory_space<vmem>>, vector<1x8x8xbf16>
    %103 = vector.shape_cast %102 : vector<1x8x8xbf16> to vector<8x8xbf16>
    %cst_66 = arith.constant dense<0.000000e+00> : vector<8x128xf32>
    %104 = tpu.matmul %103, %101, %cst_66 {dimension_numbers = #tpu.dot_dimension_numbers<[1], [0], [0], [1], [0, 0, 1, 1], [], []>} : vector<8x8xbf16>, vector<8x128xbf16>, vector<8x128xf32> -> vector<8x128xf32>
    %105 = arith.addf %96, %104 : vector<8x128xf32>
    %c0_67 = arith.constant 0 : index
    %c160 = arith.constant 160 : index
    %106 = vector.load %arg12[%c0_67, %c160] : memref<8x416xbf16, #tpu.memory_space<vmem>>, vector<8x128xbf16>
    %c7 = arith.constant 7 : index
    %c0_68 = arith.constant 0 : index
    %c0_69 = arith.constant 0 : index
    %107 = vector.load %arg8[%c7, %c0_68, %c0_69] : memref<9x8x8xbf16, #tpu.memory_space<vmem>>, vector<1x8x8xbf16>
    %108 = vector.shape_cast %107 : vector<1x8x8xbf16> to vector<8x8xbf16>
    %cst_70 = arith.constant dense<0.000000e+00> : vector<8x128xf32>
    %109 = tpu.matmul %108, %106, %cst_70 {dimension_numbers = #tpu.dot_dimension_numbers<[1], [0], [0], [1], [0, 0, 1, 1], [], []>} : vector<8x8xbf16>, vector<8x128xbf16>, vector<8x128xf32> -> vector<8x128xf32>
    %110 = arith.addf %105, %109 : vector<8x128xf32>
    %c0_71 = arith.constant 0 : index
    %c161 = arith.constant 161 : index
    %111 = vector.load %arg12[%c0_71, %c161] : memref<8x416xbf16, #tpu.memory_space<vmem>>, vector<8x128xbf16>
    %cst_72 = arith.constant 0.000000e+00 : bf16
    %112 = vector.broadcast %cst_72 : bf16 to vector<8x128xbf16>
    %113 = vector.shape_cast %49 : vector<1x128xi1> to vector<1x128xi1>
    %114 = vector.broadcast %113 : vector<1x128xi1> to vector<8x128xi1>
    %115 = arith.select %114, %111, %112 : vector<8x128xi1>, vector<8x128xbf16>
    %c8 = arith.constant 8 : index
    %c0_73 = arith.constant 0 : index
    %c0_74 = arith.constant 0 : index
    %116 = vector.load %arg8[%c8, %c0_73, %c0_74] : memref<9x8x8xbf16, #tpu.memory_space<vmem>>, vector<1x8x8xbf16>
    %117 = vector.shape_cast %116 : vector<1x8x8xbf16> to vector<8x8xbf16>
    %cst_75 = arith.constant dense<0.000000e+00> : vector<8x128xf32>
    %118 = tpu.matmul %117, %115, %cst_75 {dimension_numbers = #tpu.dot_dimension_numbers<[1], [0], [0], [1], [0, 0, 1, 1], [], []>} : vector<8x8xbf16>, vector<8x128xbf16>, vector<8x128xf32> -> vector<8x128xf32>
    %119 = arith.addf %110, %118 : vector<8x128xf32>
    %c0_76 = arith.constant 0 : index
    %c0_77 = arith.constant 0 : index
    %120 = vector.load %arg9[%c0_76, %c0_77] : memref<8x1xf32, #tpu.memory_space<vmem>>, vector<8x1xf32>
    %121 = vector.broadcast %120 : vector<8x1xf32> to vector<8x128xf32>
    %122 = arith.mulf %119, %121 : vector<8x128xf32>
    %c0_78 = arith.constant 0 : index
    %c0_79 = arith.constant 0 : index
    %123 = vector.load %arg10[%c0_78, %c0_79] : memref<8x1xf32, #tpu.memory_space<vmem>>, vector<8x1xf32>
    %124 = vector.broadcast %123 : vector<8x1xf32> to vector<8x128xf32>
    %125 = arith.addf %122, %124 : vector<8x128xf32>
    %c0_80 = arith.constant 0 : index
    %c0_81 = arith.constant 0 : index
    %c0_82 = arith.constant 0 : index
    %c0_83 = arith.constant 0 : index
    %126 = vector.load %arg11[%c0_80, %c0_81, %c0_82, %c0_83] : memref<1x1x8x128xf32, #tpu.memory_space<vmem>>, vector<1x1x8x128xf32>
    %127 = vector.shape_cast %126 : vector<1x1x8x128xf32> to vector<8x128xf32>
    %128 = vector.shape_cast %125 : vector<8x128xf32> to vector<1x1x8x128xf32>
    tpu.vector_store %arg11[%c0_80, %c0_81, %c0_82, %c0_83], %128 {strides = array<i32>} : memref<1x1x8x128xf32, #tpu.memory_space<vmem>>, vector<1x1x8x128xf32>,
    return
  }
  func.func @transform_0(%arg0: i32, %arg1: i32) -> (i32, i32, i32, i32) {
    %c0_i32 = arith.constant 0 : i32
    %c0_i32_0 = arith.constant 0 : i32
    %c0_i32_1 = arith.constant 0 : i32
    return %arg0, %arg1, %c0_i32, %c0_i32_0 : i32, i32, i32, i32
  }
  func.func @transform_1(%arg0: i32, %arg1: i32) -> (i32, i32, i32, i32) {
    %c0_i32 = arith.constant 0 : i32
    %c0_i32_0 = arith.constant 0 : i32
    %c0_i32_1 = arith.constant 0 : i32
    return %arg0, %arg1, %c0_i32, %c0_i32_0 : i32, i32, i32, i32
  }
  func.func @transform_2(%arg0: i32, %arg1: i32) -> (i32, i32) {
    %c0_i32 = arith.constant 0 : i32
    %c0_i32_0 = arith.constant 0 : i32
    %c0_i32_1 = arith.constant 0 : i32
    return %c0_i32, %c0_i32_0 : i32, i32
  }
  func.func @transform_3(%arg0: i32, %arg1: i32) -> (i32, i32) {
    %c0_i32 = arith.constant 0 : i32
    %c0_i32_0 = arith.constant 0 : i32
    %c0_i32_1 = arith.constant 0 : i32
    return %c0_i32, %c0_i32_0 : i32, i32
  }
  func.func @transform_4(%arg0: i32, %arg1: i32) -> (i32, i32) {
    %c0_i32 = arith.constant 0 : i32
    %c0_i32_0 = arith.constant 0 : i32
    %c0_i32_1 = arith.constant 0 : i32
    return %c0_i32, %c0_i32_0 : i32, i32
  }
  func.func @transform_5(%arg0: i32, %arg1: i32) -> (i32, i32) {
    %c0_i32 = arith.constant 0 : i32
    %c0_i32_0 = arith.constant 0 : i32
    %c0_i32_1 = arith.constant 0 : i32
    return %c0_i32, %c0_i32_0 : i32, i32
  }
  func.func @transform_6(%arg0: i32, %arg1: i32) -> (i32, i32, i32) {
    %c0_i32 = arith.constant 0 : i32
    %c0_i32_0 = arith.constant 0 : i32
    %c0_i32_1 = arith.constant 0 : i32
    %c0_i32_2 = arith.constant 0 : i32
    return %c0_i32, %c0_i32_0, %c0_i32_1 : i32, i32, i32
  }
  func.func @transform_7(%arg0: i32, %arg1: i32) -> (i32, i32) {
    %c0_i32 = arith.constant 0 : i32
    %c0_i32_0 = arith.constant 0 : i32
    %c0_i32_1 = arith.constant 0 : i32
    return %c0_i32, %c0_i32_0 : i32, i32
  }
  func.func @transform_8(%arg0: i32, %arg1: i32) -> (i32, i32) {
    %c0_i32 = arith.constant 0 : i32
    %c0_i32_0 = arith.constant 0 : i32
    %c0_i32_1 = arith.constant 0 : i32
    return %c0_i32, %c0_i32_0 : i32, i32
  }
  func.func @transform_9(%arg0: i32, %arg1: i32) -> (i32, i32, i32, i32) {
    %c0_i32 = arith.constant 0 : i32
    %c0_i32_0 = arith.constant 0 : i32
    %c0_i32_1 = arith.constant 0 : i32
    return %arg0, %arg1, %c0_i32, %c0_i32_0 : i32, i32, i32, i32
  }
}

</mosaic_0001>

<bundles_post_ra>
// kernel: abf_forward.1
= control target key start
LH: loop header
LB: loop body
LE: loop exit
PB: predicated region body
PF: predicated region fallthrough
CT: control target
= control target key end

     0   :  { %s1667_s30 = smov 0   ;;  %s1669_s10 = smov 0   ;;  %s1896_s0 = inlined_call_operand.vmem [shape: bf16[2,2,4,160], index: 0, kind: input, shape index: {}]   ;;  %s1897_s1 = inlined_call_operand.vmem [shape: bf16[2,2,8,160], index: 1, kind: input, shape index: {}]   ;;  %s1898_s2 = inlined_call_operand.vmem [shape: f32[4,160], index: 2, kind: input, shape index: {}]   ;;  %s1899_s3 = inlined_call_operand.vmem [shape: bf16[10,4], index: 3, kind: input, shape index: {}]   ;;  %s1900_s4 = inlined_call_operand.vmem [shape: bf16[2,8], index: 4, kind: input, shape index: {}]   ;;  %s1901_s5 = inlined_call_operand.vmem [shape: f32[10,1], index: 5, kind: input, shape index: {}]   ;;  %s1902_s6 = inlined_call_operand.vmem [shape: bf16[9,8,8], index: 6, kind: input, shape index: {}]   ;;  %s1903_s7 = inlined_call_operand.vmem [shape: f32[8,1], index: 7, kind: input, shape index: {}]   ;;  %s1904_s8 = inlined_call_operand.vmem [shape: f32[8,1], index: 8, kind: input, shape index: {}]   ;;  %s1905_s9 = inlined_call_operand.vmem [shape: f32[2,2,8,128], index: 9, kind: output, shape index: {}]  }
   0x1   :  { %s1671_s11 = smov 0   ;;  %s1673_s12 = smov 0  }
   0x2   :  { %s1675_s13 = smov 0  }
   0x3 LB: > { %s28_s14 = sadd.s32 1, %s1592_s11  ;;  %s31_s15 = sadd.s32 1, %s1596_s12  ;;  %s1600_s13 = sphi %s1675_s13, %s19_s13   ;;  %s1596_s12 = sphi %s1673_s12, %s1911_s12   ;;  %s1592_s11 = sphi %s1671_s11, %s1910_s11   ;;  %s1588_s10 = sphi %s1669_s10, %s1909_s10   ;;  %s1584_s30 = sphi %s1667_s30, %s1908_s30  }
   0x4   : > { %p29_p0 = scmp.ge.s32.totalorder %s28_s14, 2  ;;  %p1335_p1 = scmp.ge.s32.totalorder %s1600_s13, 1 }
   0x5   : > { %p323_p2 = scmp.lt.s32.totalorder %s1600_s13, 5 }
   0x6   : > { %s1913_s14 = smov (%p29_p0, %s28_s14), 0  ;;  %s1915_s15 = smov (!%p29_p0, %s31_s15), %s1596_s12 }
   0x7   : > { %p324_p3 = pnand %p1335_p1, %p323_p2  ;;  %p33_p4 = scmp.ge.s32.totalorder %s1915_s15, 2 }
   0x8   : > { %p375_p5 = scmp.lt.s32.totalorder (!%p324_p3), %s1588_s10, 1  ;;  %p377_p6 = scmp.lt.s32.totalorder (!%p324_p3), %s1584_s30, 1  ;;  %v560_v0 = vlaneseq (!%p324_p3)  ;;  %v1602_v2 = vmov (!%p324_p3), 0   ;;  %v409_v3 = vld [vmem:[%s1901_s5 + $0x8] sm:$0x3] (!%p324_p3)  ;;  %v408_v6 = vld [vmem:[%s1901_s5] sm:$0xff] (!%p324_p3) }
   0x9   : > { %s1917_s15 = smov (%p33_p4, %s1915_s15), 0  ;;  %327 = sbr.rel (%p324_p3) target bundleno = 699 (0x2bb), region = 56 }
   0xa   : > { %v561_v1 = vshrl.u32 (!%p324_p3), %v560_v0, 7  ;;  %477 = vmatprep.mubr.bf16.mxu1 (!%p324_p3), %v1602_v2  ;;  %1547 = vset.pattern.permute.xlu0 (!%p324_p3), %v1602_v2  ;;  %v622_v5 = vld [vmem:[%s1898_s2] sm:$0x1] (!%p324_p3)  ;;  %p584_p7 = scmp.gt.s32.totalorder (!%p324_p3), %s1584_s30, 0  ;;  %v624_v7 = vld [vmem:[%s1898_s2 + $0x1] sm:$0x1] (!%p324_p3) }
   0xb   : > { %1548 = vset.pattern.permute.xlu1 (!%p324_p3), %v1602_v2  ;;  %417 = vperm.xlu0 (!%p324_p3), %1547, %v409_v3   ;;  %vm623_vm0 = vcmp.gt.f32.partialorder (!%p324_p3), %v622_v5, 0.5  ;;  %vm438_vm1 = vcmask (!%p324_p3), 1041408   ;;  %vm625_vm2 = vcmp.gt.f32.partialorder (!%p324_p3), %v624_v7, 0.5  ;;  %v1354_v9 = vld [vmem:[%s1898_s2 + $0x2] ss:$4 sm:$0x3] (!%p324_p3) }
   0xc   : > { %v1712_v4 = vsub.s32 (!%p324_p3), 0, %v561_v1  ;;  %v627_v8 = vsel (!%p324_p3), %vm623_vm0, 1, %v1602_v2  ;;  %v750_v11 = vsel (!%p324_p3), %vm625_vm2, 1, %v1602_v2  ;;  %v1355_v14 = vld [vmem:[%s1898_s2 + $0x3] ss:$4 sm:$0x3] (!%p324_p3) }
   0xd   : > { %vm498_vm3 = vcmask (!%p324_p3), 1043456   ;;  %v1549_v22 = vld [vmem:[%s1899_s3] sm:$0x1f] (!%p324_p3)   ;;  %vm434_vm7 = vcmask (!%p324_p3), 31744   ;;  %s1604_s19 = smov (!%p324_p3), 31   ;;  %v1762_v30 = vsub.s32 (!%p324_p3), 1, %v561_v1 }
   0xe   : > { %v631_v10 = vrot.slane (!%p324_p3), %v627_v8, %v1712_v4  ;;  %v754_v15 = vrot.slane (!%p324_p3), %v750_v11, %v1712_v4  ;;  %v488_v33 = vld [vmem:[%s1900_s4] sm:$0x1] (!%p324_p3)  ;;  %vm494_vm9 = vcmask (!%p324_p3), 64512   ;;  %s1607_s24 = smov (!%p324_p3), 127   ;;  %s1608_s25 = smov (!%p324_p3), 33   ;;  %v1609_v34 = vmov (!%p324_p3), 0.0  }
   0xf   : > { %412 = vperm.xlu0 (!%p324_p3), %1547, %v408_v6   ;;  %1427 = vmatprep.subr.bf16.mxu0 (!%p324_p3), %v1609_v34  ;;  %vm619_vm10 = vcmask (!%p324_p3), 261124   ;;  %vm826_vm12 = vcmask (!%p324_p3), 121856   ;;  %vm953_vm13 = vcmask (!%p324_p3), 138240   ;;  %vm1610_vm14 = vmmov (!%p324_p3), 0   ;;  %s1614_s18 = smov (!%p324_p3), 97  }
  0x10   : > { %s1919_s10 = smov (!%p375_p5, %s1588_s10), 1  ;;  %vm632_vm4 = vcmp.eq.s32.totalorder %v631_v10, 1  ;;  %vm1749_vm5 = vcmp.eq.s32.totalorder %v754_v15, 1  ;;  %vm620_vm11 = vmor %vm619_vm10, %vm498_vm3  ;;  %1429 = vmatprep.mubr.msk.bf16.mxu0 %vm1610_vm14, %v1609_v34  ;;  %vm1020_vm0 = vcmask 252928   ;;  %vm638_vm2 = vcmask 1039360  }
  0x11   : > { %s1705_s16 = scalar_select %p377_p6, %s1584_s30, 1  ;;  %vm633_vm6 = vmpackc.low %vm632_vm4, %vm632_vm4 }
  0x12   : > { %s1337_s17 = sshll.u32 %s1919_s10, 2  ;;  %v634_v25 = vsel %vm633_vm6, 65537, %v1602_v2  ;;  %vm756_vm8 = vmpackc.low %vm1749_vm5, %vm1749_vm5  ;;  %s1603_s30 = smov 15   ;;  %vm701_vm6 = vcmask 7168  }
  0x13   : > { %s1336_s20 = sshll.u32 %s1705_s16, 1  ;;  %823 = vrot.lane.b32.xlu1 %v634_v25, %s1603_s30  ;;  %v757_v29 = vsel %vm756_vm8, 65537, %v1602_v2  ;;  %1017 = vrot.lane.b32.xlu0 %v634_v25, %s1604_s19  ;;  %s1615_s30 = smov 96  }
  0x14   : > { %s381_s23 = sadd.s32 %s1337_s17, %s1336_s20  ;;  %s1606_s20 = smov 1  }
  0x15   : > { %s1338_s28 = sshll.u32 %s381_s23, 1  ;;  %s1341_s29 = sshll.u32 %s381_s23, 2 }
  0x16   : > { %s383_s17 = scalar_lea.vmem %s1896_s0, %s1338_s28  ;;  %s392_s22 = scalar_lea.vmem %s1897_s1, %s1341_s29 }
  0x17   : > { %v1345_v12 = vld.sshfl [vmem:[%s383_s17] sm:$0x33 pattern:$0x76325410]  ;;  %s585_s27 = scalar_select %p584_p7, 0.0, 1.0  ;;  %758 = vrot.lane.b32.xlu0 %v757_v29, %s1606_s20 }
  0x18   : > { %v1734_v13 = vld [vmem:[%s392_s22] sm:$0xff]  ;;  %v433_v16 = vcombine.high %v1345_v12, %v1345_v12  ;;  %v440_v17 = vsel %vm438_vm1, %v1345_v12, 0  ;;  %s587_s28 = scalar_select %p377_p6, 0.0, 1.0 }
  0x19   : > { %v1349_v18 = vcombine.high %v1734_v13, %v1734_v13  ;;  %v1348_v19 = vcombine.low %v1734_v13, %v1734_v13  ;;  %v590_v21 = vstv %s585_s27  ;;  %s1605_s17 = smov 17   ;;  %v570_v55 = vunpack.c.l.bf16 %v1734_v13  ;;  %s1611_s23 = smov 113  }
  0x1a   : > { %1346 = vmatprep.subr.msk.bf16.mxu1 %vm438_vm1, %v433_v16  ;;  %v591_v23 = vmul.f32 %v1354_v9, %v590_v21  ;;  %v595_v24 = vstv %s587_s28  ;;  %950 = vrot.lane.b32.xlu1 %v757_v29, %s1605_s17  ;;  %v571_v57 = vunpack.c.h.bf16 %v1734_v13  ;;  %s1612_s28 = smov 112   ;;  %s1613_s29 = smov 111  }
  0x1b   : > { %446 = vmatpush1.bf16.msra.mxu1 %v440_v17  ;;  %v596_v26 = vmul.f32 %v1355_v14, %v595_v24  ;;  %v500_v27 = vsel %vm498_vm3, %v1348_v19, 0  ;;  %s1616_s19 = smov 95  }
  0x1c   : > { %1350 = vmatprep.subr.msk.bf16.mxu1 %vm498_vm3, %v1349_v18  ;;  %v592_v28 = vsub.f32 1.0, %v591_v23 }
  0x1e   : > { %1347 = vmatmul.mubr.msk.bf16.vlgmr.msra.gmra.mrb[0].mxu1 %vm434_vm7, %v1549_v22  ;;  %v597_v31 = vsub.f32 %v592_v28, %v596_v26  ;;  %635 = vrot.lane.b32.xlu1 %v634_v25, %s1607_s24  ;;  %v1357_v28 = vld [vmem:[%s1902_s6 + $0x4] sm:$0xf]  ;;  %vm1142_vm7 = vcmask 269312  }
  0x1f   : > { %506 = vmatpush1.bf16.msra.mxu1 %v500_v27  ;;  %537 = vmatprep.mubr.bf16.mxu1 %v1602_v2 }
  0x20   : > { %v606_v32 = vrot.slane %v597_v31, %v1762_v30  ;;  %1409 = vmatprep.subr.bf16.mxu1 %v1609_v34  ;;  %v602_v1 = vrot.slane %v597_v31, %v1712_v4 }
  0x22   : > { %1139 = vrot.lane.b32.xlu1 %v757_v29, %s1608_s25 }
  0x26   : > { %1351 = vmatmul.mubr.msk.bf16.vlgmr.msra.gmra.mrb[4].mxu1 %vm494_vm9, %v488_v33 }
  0x27   : > { %1411 = vmatprep.mubr.msk.bf16.mxu1 %vm1610_vm14, %v1609_v34 }
  0x85   : > { %v824_v11 = vpop.permute.xlu1 %823 }
  0x86   : > { %v825_v13 = vrot.slane %v824_v11, 4 }
  0x88   : > { %v827_v15 = vsel %vm826_vm12, %v825_v13, %v824_v11  ;;  %vm901_vm12 = vcmask 916480  }
  0x89   : > { %vm828_vm15 = vcmp.ne.s16.totalorder %v827_v15, 0  ;;  %v642_v15 = vld [vmem:[%s1902_s6] sm:$0xf] }
  0x8a   : > { %v418_v39 = vpop.permute.xlu0 %417 }
  0x8c   : > { %v951_v14 = vpop.permute.xlu1 %950 }
  0x8d   : > { %v952_v16 = vrot.slane %v951_v14, 4 }
  0x8e   : > { %v413_v54 = vpop.permute.xlu0 %412 }
  0x8f   : > { %v954_v20 = vsel %vm953_vm13, %v952_v16, %v951_v14  ;;  %vm968_vm13 = vcmask 908288  }
  0x90   : > { %vm955_vm1 = vcmp.ne.s16.totalorder %v954_v20, 0  ;;  %v636_v25 = vpop.permute.xlu1 %635 }
  0x91   : > { %v637_v26 = vrot.slane %v636_v25, 4 }
  0x92   : > { %v1018_v17 = vpop.permute.xlu0 %1017 }
  0x93   : > { %v1019_v21 = vrot.slane %v1018_v17, 4 }
  0x95   : > { %v1021_v27 = vsel %vm1020_vm0, %v1019_v21, %v1018_v17  ;;  %v1374_v21 = vld [vmem:[%s1902_s6 + $0x14] sm:$0xf]  ;;  %vm1090_vm0 = vcmask 785408  }
  0x96   : > { %vm1022_vm4 = vcmp.ne.s16.totalorder %v1021_v27, 0  ;;  %v759_v33 = vpop.permute.xlu0 %758 }
  0xf1   : > { %v479_v35 = vpop.f32.mrb[0].mxu1 }
  0xf2   : > { %v481_v36 = vpop.f32.mrb[1].mxu1  ;;  %v480_v59 = vadd.f32 %v479_v35, %v413_v54 }
  0xf3   : > { %v483_v37 = vpop.f32.mrb[2].mxu1  ;;  %v482_v62 = vadd.f32 %v481_v36, %v413_v54 }
  0xf4   : > { %v485_v38 = vpop.f32.mrb[3].mxu1  ;;  %v484_v40 = vadd.f32 %v483_v37, %v418_v39 }
  0xf5   : > { %v486_v41 = vadd.f32 %v485_v38, %v418_v39  ;;  %v760_v39 = vrot.slane %v759_v33, 4 }
  0xf9   : > { %v539_v42 = vpop.f32.mrb[4].mxu1 }
  0xfa   : > { %v546_v43 = vadd.f32 %v539_v42, %v484_v40  ;;  %v541_v44 = vpop.f32.mrb[5].mxu1  ;;  %v1140_v40 = vpop.permute.xlu1 %1139 }
  0xfb   : > { %v547_v45 = vadd.f32 %v541_v44, %v486_v41  ;;  %v543_v46 = vpop.f32.mrb[6].mxu1  ;;  %v1141_v44 = vrot.slane %v1140_v40, 4 }
  0xfc   : > { %v1352_v47 = vmul.f32 -1.442695, %v546_v43  ;;  %v544_v48 = vpop.f32.mrb[7].mxu1 }
  0xfd   : > { %v1353_v49 = vmul.f32 -1.442695, %v547_v45  ;;  %v761_v45 = vsel %vm701_vm6, %v760_v39, %v759_v33  ;;  %v1143_v48 = vsel %vm1142_vm7, %v1141_v44, %v1140_v40 }
  0xfe   : > { %1554 = vpow2.f32 %v1352_v47  ;;  %vm762_vm8 = vcmp.ne.s16.totalorder %v761_v45, 0  ;;  %vm1144_vm10 = vcmp.ne.s16.totalorder %v1143_v48, 0 }
  0xff   : > { %1556 = vpow2.f32 %v1353_v49 }
 0x108   : > { %v1555_v50 = vpop.eup %1554 }
 0x109   : > { %v1557_v51 = vpop.eup %1556  ;;  %v554_v52 = vadd.f32 1.0, %v1555_v50 }
 0x10a   : > { %v555_v53 = vadd.f32 1.0, %v1557_v51 }
 0x10b   : > { %1558 = vrcp.f32 %v554_v52 }
 0x10c   : > { %1560 = vrcp.f32 %v555_v53 }
 0x115   : > { %v1559_v56 = vpop.eup %1558 }
 0x116   : > { %v1561_v58 = vpop.eup %1560  ;;  %v563_v60 = vrot.slane %v1559_v56, %v1712_v4  ;;  %v575_v61 = vrot.slane %v1559_v56, %v1762_v30  ;;  %v1213_v56 = vld [vmem:[%s1904_s8] sm:$0xff] }
 0x117   : > { %v567_v63 = vrot.slane %v1561_v58, %v1712_v4  ;;  %v579_v0 = vrot.slane %v1561_v58, %v1762_v30 }
 0x118   : > { %v568_v2 = vmul.f32 %v563_v60, %v480_v59  ;;  %v580_v3 = vmul.f32 %v575_v61, %v570_v55  ;;  %v1206_v55 = vld [vmem:[%s1903_s7] sm:$0xff] }
 0x119   : > { %v569_v5 = vmul.f32 %v567_v63, %v482_v62  ;;  %v581_v6 = vmul.f32 %v579_v0, %v571_v57  ;;  %v1366_v62 = vld [vmem:[%s1902_s6 + $0xc] sm:$0xf] }
 0x11a   : > { %v582_v7 = vadd.f32 %v580_v3, %v568_v2 }
 0x11b   : > { %v583_v8 = vadd.f32 %v581_v6, %v569_v5 }
 0x11c   : > { %v609_v9 = vmul.f32 %v602_v1, %v582_v7 }
 0x11d   : > { %v610_v10 = vmul.f32 %v606_v32, %v583_v8  ;;  %v639_v32 = vsel %vm638_vm2, %v637_v26, %v636_v25  ;;  %v1378_v25 = vld [vmem:[%s1902_s6 + $0x18] sm:$0xf] }
 0x11e   : > { %vm640_vm5 = vcmp.ne.s16.totalorder %v639_v32, 0  ;;  %v1384_v32 = vld [vmem:[%s1902_s6 + $0x20] sm:$0xf] }
 0x11f   : > { %v1390_v12 = vpack.c.bf16 %v610_v10, %v609_v9  ;;  %v1370_v9 = vld [vmem:[%s1902_s6 + $0x10] sm:$0xf] }
 0x121   : > { %621 = vst.msk [vmem:[#allocation2 + $0x4] sm:$0xff] %vm620_vm11, %v1390_v12  ;;  %vm841_vm11 = vcmask 924672  }
 0x128   : > { %v1785_v4 = vld [vmem:[#allocation2 + $0x4] sm:$0xff] }
 0x129   : > { %v643_v18 = vld [vmem:[#allocation2 + $0x4] sm:$0xf]  ;;  %v829_v19 = vsel %vm828_vm15, %v1785_v4, 0  ;;  %v1372_v29 = vcombine.high %v1785_v4, %v1785_v4  ;;  %v956_v30 = vsel %vm955_vm1, %v1785_v4, 0  ;;  %v1371_v31 = vcombine.low %v1785_v4, %v1785_v4 }
 0x12a   : > { %v650_v22 = vsel %vm498_vm3, %v643_v18, 0  ;;  %v1368_v23 = vcombine.high %v829_v19, %v829_v19  ;;  %v1367_v24 = vcombine.low %v829_v19, %v829_v19  ;;  %v1376_v35 = vcombine.high %v956_v30, %v956_v30  ;;  %v626_v38 = vld [vmem:[#allocation2] sm:$0xff] }
 0x12b   : > { %1410 = vmatpush3.bf16.msra.mxu1 %v650_v22  ;;  %v1023_v36 = vsel %vm1022_vm4, %v1785_v4, 0  ;;  %v1375_v37 = vcombine.low %v956_v30, %v956_v30  ;;  %v641_v42 = vsel %vm640_vm5, %v626_v38, 0  ;;  %v763_v49 = vsel %vm762_vm8, %v1785_v4, 0  ;;  %v1382_v30 = vld [vmem:[%s1902_s6 + $0x1c] sm:$0xf] }
 0x12c   : > { %839 = vrot.lane.b32.xlu1 %v1368_v23, %s1611_s23  ;;  %837 = vrot.lane.b32.xlu0 %v1367_v24, %s1611_s23  ;;  %v1380_v41 = vcombine.high %v1023_v36, %v1023_v36  ;;  %v1379_v43 = vcombine.low %v1023_v36, %v1023_v36  ;;  %v1360_v46 = vcombine.high %v641_v42, %v641_v42  ;;  %v1145_v51 = vsel %vm1144_vm10, %v1785_v4, 0  ;;  %v1362_v23 = vld [vmem:[%s1902_s6 + $0x8] sm:$0xf]  ;;  %s1342_s23 = sshll.u32 %s1919_s10, 1 }
 0x12d   : > { %1415 = vmatprep.subr.bf16.mxu1 %v1609_v34  ;;  %v1359_v47 = vcombine.low %v641_v42, %v641_v42  ;;  %v1364_v50 = vcombine.high %v763_v49, %v763_v49  ;;  %v1363_v52 = vcombine.low %v763_v49, %v763_v49  ;;  %v1386_v53 = vcombine.high %v1145_v51, %v1145_v51  ;;  %s398_s26 = sadd.s32 %s1342_s23, %s1705_s16 }
 0x12e   : > { %1412 = vmatmul.mubr.msk.bf16.vlgmr.msra.gmra.mrb[8].mxu1 %vm494_vm9, %v1357_v28  ;;  %v1385_v54 = vcombine.low %v1145_v51, %v1145_v51  ;;  %vm1035_vm15 = vcmask 793600   ;;  %vm1157_vm1 = vcmask 777216   ;;  %s1343_s27 = sshll.u32 %s398_s26, 3 }
 0x12f   : > { %1417 = vmatprep.mubr.msk.bf16.mxu1 %vm1610_vm14, %v1609_v34 }
 0x130   : > { %899 = vrot.lane.b32.xlu1 %v1372_v29, %s1612_s28  ;;  %897 = vrot.lane.b32.xlu0 %v1371_v31, %s1612_s28 }
 0x134   : > { %966 = vrot.lane.b32.xlu1 %v1376_v35, %s1613_s29  ;;  %964 = vrot.lane.b32.xlu0 %v1375_v37, %s1613_s29 }
 0x138   : > { %1033 = vrot.lane.b32.xlu1 %v1380_v41, %s1614_s18  ;;  %1031 = vrot.lane.b32.xlu0 %v1379_v43, %s1614_s18  ;;  %s400_s18 = scalar_lea.vmem %s1905_s9, %s1343_s27 }
 0x13c   : > { %699 = vrot.lane.b32.xlu1 %v1360_v46, %s1606_s20  ;;  %697 = vrot.lane.b32.xlu0 %v1359_v47, %s1606_s20 }
 0x140   : > { %1088 = vrot.lane.b32.xlu1 %v1372_v29, %s1615_s30  ;;  %1086 = vrot.lane.b32.xlu0 %v1371_v31, %s1615_s30 }
 0x144   : > { %773 = vrot.lane.b32.xlu1 %v1364_v50, %s1607_s24  ;;  %771 = vrot.lane.b32.xlu0 %v1363_v52, %s1607_s24 }
 0x148   : > { %1155 = vrot.lane.b32.xlu1 %v1386_v53, %s1616_s19  ;;  %1153 = vrot.lane.b32.xlu0 %v1385_v54, %s1616_s19 }
 0x14c   : > { %1209 = vperm.xlu0 %1547, %v1206_v55   ;;  %1216 = vperm.xlu1 %1548, %v1213_v56  }
 0x19e   : > { %v840_v57 = vpop.permute.xlu1 %839  ;;  %v838_v58 = vpop.permute.xlu0 %837 }
 0x19f   : > { %v842_v59 = vsel %vm841_vm11, %v838_v58, %v840_v57 }
 0x1a0   : > { %v847_v60 = vsel %vm498_vm3, %v842_v59, 0 }
 0x1a1   : > { %1428 = vmatpush3.bf16.msra.mxu0 %v847_v60 }
 0x1a2   : > { %v900_v61 = vpop.permute.xlu1 %899  ;;  %v898_v63 = vpop.permute.xlu0 %897  ;;  %1433 = vmatprep.subr.bf16.mxu0 %v1609_v34 }
 0x1a3   : > { %v902_v0 = vsel %vm901_vm12, %v898_v63, %v900_v61 }
 0x1a4   : > { %v907_v1 = vsel %vm498_vm3, %v902_v0, 0  ;;  %1430 = vmatmul.mubr.msk.bf16.vlgmr.msra.gmra.mrb[0].mxu0 %vm494_vm9, %v1366_v62 }
 0x1a5   : > { %1434 = vmatpush3.bf16.msra.mxu0 %v907_v1  ;;  %1435 = vmatprep.mubr.msk.bf16.mxu0 %vm1610_vm14, %v1609_v34 }
 0x1a6   : > { %v967_v2 = vpop.permute.xlu1 %966  ;;  %v965_v3 = vpop.permute.xlu0 %964  ;;  %1439 = vmatprep.subr.bf16.mxu0 %v1609_v34 }
 0x1a7   : > { %v969_v7 = vsel %vm968_vm13, %v965_v3, %v967_v2 }
 0x1a8   : > { %v974_v12 = vsel %vm498_vm3, %v969_v7, 0 }
 0x1aa   : > { %v1034_v5 = vpop.permute.xlu1 %1033  ;;  %v1032_v6 = vpop.permute.xlu0 %1031 }
 0x1ab   : > { %v1036_v20 = vsel %vm1035_vm15, %v1032_v6, %v1034_v5 }
 0x1ac   : > { %v1041_v22 = vsel %vm498_vm3, %v1036_v20, 0 }
 0x1ae   : > { %v700_v8 = vpop.permute.xlu1 %699  ;;  %v698_v10 = vpop.permute.xlu0 %697 }
 0x1af   : > { %v702_v11 = vsel %vm701_vm6, %v698_v10, %v700_v8 }
 0x1b0   : > { %v707_v13 = vsel %vm498_vm3, %v702_v11, 0  ;;  %1436 = vmatmul.mubr.msk.bf16.vlgmr.msra.gmra.mrb[0].mxu0 %vm494_vm9, %v1370_v9 }
 0x1b1   : > { %1440 = vmatpush3.bf16.msra.mxu0 %v974_v12  ;;  %1416 = vmatpush3.bf16.msra.mxu1 %v707_v13 }
 0x1b2   : > { %v1089_v14 = vpop.permute.xlu1 %1088  ;;  %v1087_v16 = vpop.permute.xlu0 %1086  ;;  %1421 = vmatprep.subr.bf16.mxu1 %v1609_v34  ;;  %1441 = vmatprep.mubr.msk.bf16.mxu0 %vm1610_vm14, %v1609_v34 }
 0x1b3   : > { %1445 = vmatprep.subr.bf16.mxu0 %v1609_v34  ;;  %v1091_v24 = vsel %vm1090_vm0, %v1087_v16, %v1089_v14 }
 0x1b4   : > { %1418 = vmatmul.mubr.msk.bf16.vlgmr.msra.gmra.mrb[8].mxu1 %vm494_vm9, %v642_v15  ;;  %v1096_v26 = vsel %vm498_vm3, %v1091_v24, 0 }
 0x1b5   : > { %1423 = vmatprep.mubr.msk.bf16.mxu1 %vm1610_vm14, %v1609_v34 }
 0x1b6   : > { %v774_v4 = vpop.permute.xlu1 %773  ;;  %v772_v17 = vpop.permute.xlu0 %771 }
 0x1b7   : > { %v775_v18 = vsel %vm638_vm2, %v772_v17, %v774_v4 }
 0x1b8   : > { %v780_v19 = vsel %vm498_vm3, %v775_v18, 0 }
 0x1b9   : > { %1422 = vmatpush3.bf16.msra.mxu1 %v780_v19 }
 0x1ba   : > { %v1156_v27 = vpop.permute.xlu1 %1155  ;;  %v1154_v28 = vpop.permute.xlu0 %1153 }
 0x1bb   : > { %v1158_v29 = vsel %vm1157_vm1, %v1154_v28, %v1156_v27 }
 0x1bc   : > { %1442 = vmatmul.mubr.msk.bf16.vlgmr.msra.gmra.mrb[0].mxu0 %vm494_vm9, %v1374_v21  ;;  %v1163_v31 = vsel %vm498_vm3, %v1158_v29, 0 }
 0x1bd   : > { %1446 = vmatpush3.bf16.msra.mxu0 %v1041_v22  ;;  %1447 = vmatprep.mubr.msk.bf16.mxu0 %vm1610_vm14, %v1609_v34 }
 0x1be   : > { %1451 = vmatprep.subr.bf16.mxu0 %v1609_v34 }
 0x1c0   : > { %1424 = vmatmul.mubr.msk.bf16.vlgmr.msra.gmra.mrb[8].mxu1 %vm494_vm9, %v1362_v23 }
 0x1c8   : > { %1448 = vmatmul.mubr.msk.bf16.vlgmr.msra.gmra.mrb[0].mxu0 %vm494_vm9, %v1378_v25 }
 0x1c9   : > { %1452 = vmatpush3.bf16.msra.mxu0 %v1096_v26  ;;  %1453 = vmatprep.mubr.msk.bf16.mxu0 %vm1610_vm14, %v1609_v34 }
 0x1ca   : > { %1457 = vmatprep.subr.bf16.mxu0 %v1609_v34 }
 0x1cb   : > { %v1210_v39 = vpop.permute.xlu0 %1209  ;;  %v1217_v43 = vpop.permute.xlu1 %1216 }
 0x1d4   : > { %1454 = vmatmul.mubr.msk.bf16.vlgmr.msra.gmra.mrb[0].mxu0 %vm494_vm9, %v1382_v30 }
 0x1d5   : > { %1458 = vmatpush3.bf16.msra.mxu0 %v1163_v31  ;;  %1459 = vmatprep.mubr.msk.bf16.mxu0 %vm1610_vm14, %v1609_v34 }
 0x1e0   : > { %1460 = vmatmul.mubr.msk.bf16.vlgmr.msra.gmra.mrb[0].mxu0 %vm494_vm9, %v1384_v32 }
 0x293   : > { %v816_v33 = vpop.f32.mrb[8].mxu1 }
 0x294   : > { %v1425_v35 = vpop.f32.mrb[9].mxu1 }
 0x295   : > { %v819_v36 = vpop.f32.mrb[10].mxu1 }
 0x296   : > { %v1426_v37 = vpop.f32.mrb[11].mxu1 }
 0x2b3   : > { %v1199_v38 = vpop.f32.mrb[0].mxu0 }
 0x2b4   : > { %v1463_v40 = vadd.f32 %v1199_v38, %v816_v33  ;;  %v1461_v41 = vpop.f32.mrb[1].mxu0 }
 0x2b5   : > { %v1202_v42 = vpop.f32.mrb[2].mxu0 }
 0x2b6   : > { %v1462_v34 = vpop.f32.mrb[3].mxu0  ;;  %v1212_v44 = vmul.f32 %v1463_v40, %v1210_v39 }
 0x2b8   : > { %v1219_v45 = vadd.f32 %v1217_v43, %v1212_v44 }
 0x2ba   : > { %1220 = vst [vmem:[%s400_s18] sm:$0xff] %v1219_v45 }
 0x2bb PF: > { %s19_s13 = sadd.s32 1, %s1600_s13   ;;  %s1908_s30 = smov %s1592_s11 }
 0x2bc   : > { %p16_p8 = scmp.ge.s32.totalorder %s19_s13, 6   ;;  %s1909_s10 = smov %s1596_s12 }
 0x2bd   : > { %s1910_s11 = smov %s1913_s14  ;;  %s1911_s12 = smov %s1917_s15 }
 0x2be   :  { %18 = sbr.rel (!%p16_p8) target bundleno = 3 (0x3), region = 99 }

</bundles_post_ra>
